<compile_context>
chip_gen: v5e
topology: v5e:2x2
jax: 0.10.0
libtpu: 0.0.40
codegen_flags: <defaults>
</compile_context>

<pallas_src>
import jax
import jax.numpy as jnp
import numpy as np
from jax.experimental import pallas as pl
from jax.experimental.pallas import tpu as pltpu


def _maxpool2x2_kernel(x_ref, sel_ref, o_ref):
    """x_ref:   [TB, 2, Wp]  rows of H-pairs; the full (cropped) image row on lanes
       sel_ref: [Lc, Lc]     constant 0/1 de-interleave matrix:
                             sel[2j, j] = 1 (even cols -> first half),
                             sel[2j+1, Lc//2 + j] = 1 (odd cols -> second half)
       o_ref:   [TB, W2]
    """
    # H-pair max: plain VPU max of the two sublanes of each slab.
    m = jnp.maximum(x_ref[:, 0, :], x_ref[:, 1, :])          # [TB, Wp]

    Wp = m.shape[-1]
    Lc = sel_ref.shape[0]
    half = Lc // 2
    sel = sel_ref[...]

    # W-pair max: de-interleave even/odd lanes with a 0/1 selection matmul on the
    # (otherwise idle) MXU, then take contiguous half-slice maxima.
    # TODO(synk): the 0/1 selection matmul sums 0*x terms, so a NaN/Inf anywhere in a
    # row spreads to every pooled output of that row (PyTorch confines it to its own
    # 2x2 window); switch to a strided lane gather once Mosaic supports it.
    parts = []
    for c in range(Wp // Lc):
        d = jnp.dot(m[:, c * Lc:(c + 1) * Lc], sel,
                    precision=jax.lax.Precision.HIGHEST,
                    preferred_element_type=jnp.float32)       # [TB, Lc]
        parts.append(jnp.maximum(d[:, :half], d[:, half:]))   # [TB, Lc//2]
    out = parts[0] if len(parts) == 1 else jnp.concatenate(parts, axis=-1)
    o_ref[...] = out.astype(o_ref.dtype)                      # single lane-dense store


def _make_sel(lc, dtype):
    """[lc, lc] 0/1 matrix: column j picks lane 2j, column lc//2+j picks lane 2j+1."""
    half = lc // 2
    s = np.zeros((lc, lc), dtype=np.float32)
    j = np.arange(half)
    s[2 * j, j] = 1.0
    s[2 * j + 1, half + j] = 1.0
    return jnp.asarray(s, dtype=dtype)


def _pick_block_rows(rows, bytes_per_row, vmem_budget=10 << 20, min_steps=8):
    """Rows of output per grid step: as large as the (double-buffered, padding-aware)
    VMEM budget allows, but with >= min_steps grid steps when the problem is big
    enough (keeps both v7x TensorCores pipelined); multiple of 8 for aligned stores."""
    cap = max(1, vmem_budget // max(1, bytes_per_row))
    if rows // min_steps >= 8:
        cap = min(cap, pl.cdiv(rows, min_steps))
    if cap >= rows:
        return rows                       # single full block (always a legal shape)
    return max(8, (cap // 8) * 8)


def max_pool_2x2(x_nchw):
    """Forward pass of DownSample: nn.MaxPool2d(kernel_size=2, stride=2). NCHW in/out."""
    N, C, H, W = x_nchw.shape
    H2, W2 = H // 2, W // 2
    if N * C == 0 or H2 == 0 or W2 == 0:
        return jnp.zeros((N, C, H2, W2), x_nchw.dtype)

    Wp = 2 * W2
    # floor-mode crop (PyTorch default); a no-op for even H, W
    x = x_nchw[:, :, : 2 * H2, :Wp]

    # NCHW-native view: contiguity-preserving reshape only — NO transposes.
    rows = N * C * H2
    xr = x.reshape(rows, 2, Wp)                      # [rows, H-pair, W]

    # Lane-chunk width for the in-kernel de-interleave (bounds MXU MACs/element).
    Lc = 128 if Wp % 128 == 0 else Wp
    sel = _make_sel(Lc, x_nchw.dtype)

    # Padding-aware VMEM sizing: lane dims round up to 128, the (2, Wp) input slab's
    # sublane dim conservatively to the dtype's native tile; x2 for double buffering.
    itemsize = jnp.dtype(x_nchw.dtype).itemsize
    sub = max(8, 32 // itemsize)                     # 8 (f32) / 16 (bf16) / 32 (int8)
    lane_in = pl.cdiv(Wp, 128) * 128
    lane_out = pl.cdiv(W2, 128) * 128
    bytes_per_row = 2 * (sub * lane_in + lane_out) * itemsize
    block_rows = _pick_block_rows(rows, bytes_per_row)
    grid = (pl.cdiv(rows, block_rows),)              # ragged last block is fine

    out = pl.pallas_call(
        _maxpool2x2_kernel,
        out_shape=jax.ShapeDtypeStruct((rows, W2), x_nchw.dtype),
        grid_spec=pltpu.PrefetchScalarGridSpec(
            num_scalar_prefetch=0,
            grid=grid,
            in_specs=[
                pl.BlockSpec((block_rows, 2, Wp), lambda i: (i, 0, 0)),
                pl.BlockSpec((Lc, Lc), lambda i: (0, 0)),    # constant block: fetched once
            ],
            out_specs=pl.BlockSpec((block_rows, W2), lambda i: (i, 0)),
        ),
        compiler_params=pltpu.CompilerParams(
            dimension_semantics=("parallel",),
            vmem_limit_bytes=32 * 1024 * 1024,
        ),
    )(xr, sel)

    return out.reshape(N, C, H2, W2)


def _reference(x_nchw):
    """Pure-JAX reference: 2x2/stride-2 max pool (floor mode), NCHW in/out."""
    N, C, H, W = x_nchw.shape
    H2, W2 = H // 2, W // 2
    x = x_nchw[:, :, : 2 * H2, : 2 * W2]
    return jnp.max(x.reshape(N, C, H2, 2, W2, 2), axis=(3, 5))


if __name__ == "__main__":
    key = jax.random.PRNGKey(0)
    N, C, H, W = 2, 4, 16, 16
    x = jax.random.normal(key, (N, C, H, W), jnp.float32)    # NCHW, like PyTorch
    # Keep the test values bf16-representable so the exact-equality check below is
    # independent of how many MXU passes the f32 selection matmul uses (the kernel
    # requests HIGHEST precision, which is exact for arbitrary f32 inputs as well).
    x = x.astype(jnp.bfloat16).astype(jnp.float32)

    out = jax.block_until_ready(max_pool_2x2(x))
    ref = jax.block_until_ready(_reference(x))

    assert out.shape == (N, C, H // 2, W // 2), out.shape
    assert out.dtype == x.dtype, out.dtype
    assert jnp.array_equal(out, ref), "mismatch vs reference"
    print("KERNEL_OK")
</pallas_src>

<mosaic_0001>
module attributes {stable_mosaic.version = 11 : i64} {
  func.func @_maxpool2x2_kernel(%arg0: i32, %arg1: memref<8x2x16xf32, #tpu.memory_space<vmem>>, %arg2: memref<16x16xf32, #tpu.memory_space<vmem>>, %arg3: memref<8x8xf32, #tpu.memory_space<vmem>>) attributes {dimension_semantics = [#tpu.dimension_semantics<parallel>], iteration_bounds = array<i64: 8>, scalar_prefetch = 0 : i64, scratch_operands = 0 : i64, tpu.core_type = #tpu.core_type<tc>, window_params = [{transform_indices = @transform_0, window_bounds = array<i64: 8, 2, 16>}, {pipeline_mode = #tpu.pipeline_mode<synchronous>, transform_indices = @transform_1, window_bounds = array<i64: 16, 16>}, {transform_indices = @transform_2, window_bounds = array<i64: 8, 8>}]} {
    %c0 = arith.constant 0 : index
    %c0_0 = arith.constant 0 : index
    %c0_1 = arith.constant 0 : index
    %0 = vector.load %arg1[%c0, %c0_0, %c0_1] : memref<8x2x16xf32, #tpu.memory_space<vmem>>, vector<8x1x16xf32>
    %1 = vector.shape_cast %0 : vector<8x1x16xf32> to vector<8x16xf32>
    %c0_2 = arith.constant 0 : index
    %c1 = arith.constant 1 : index
    %c0_3 = arith.constant 0 : index
    %2 = vector.load %arg1[%c0_2, %c1, %c0_3] : memref<8x2x16xf32, #tpu.memory_space<vmem>>, vector<8x1x16xf32>
    %3 = vector.shape_cast %2 : vector<8x1x16xf32> to vector<8x16xf32>
    %4 = arith.maximumf %1, %3 : vector<8x16xf32>
    %c0_4 = arith.constant 0 : index
    %c0_5 = arith.constant 0 : index
    %5 = vector.load %arg2[%c0_4, %c0_5] : memref<16x16xf32, #tpu.memory_space<vmem>>, vector<16x16xf32>
    %cst = arith.constant dense<0.000000e+00> : vector<8x16xf32>
    %6 = tpu.matmul %4, %5, %cst {dimension_numbers = #tpu.dot_dimension_numbers<[1], [0], [0], [1], [0, 0, 1, 1], [], []>, precision = #tpu.contract_precision<fp32>} : vector<8x16xf32>, vector<16x16xf32>, vector<8x16xf32> -> vector<8x16xf32>
    %7 = vector.extract_strided_slice %6 {offsets = [0, 0], sizes = [8, 8], strides = [1, 1]} : vector<8x16xf32> to vector<8x8xf32>
    %8 = vector.extract_strided_slice %6 {offsets = [0, 8], sizes = [8, 8], strides = [1, 1]} : vector<8x16xf32> to vector<8x8xf32>
    %9 = arith.maximumf %7, %8 : vector<8x8xf32>
    %c0_6 = arith.constant 0 : index
    %c0_7 = arith.constant 0 : index
    %10 = vector.load %arg3[%c0_6, %c0_7] : memref<8x8xf32, #tpu.memory_space<vmem>>, vector<8x8xf32>
    tpu.vector_store %arg3[%c0_6, %c0_7], %9 {strides = array<i32>} : memref<8x8xf32, #tpu.memory_space<vmem>>, vector<8x8xf32>,
    return
  }
  func.func @transform_0(%arg0: i32) -> (i32, i32, i32) {
    %c0_i32 = arith.constant 0 : i32
    %c0_i32_0 = arith.constant 0 : i32
    %c0_i32_1 = arith.constant 0 : i32
    return %arg0, %c0_i32, %c0_i32_0 : i32, i32, i32
  }
  func.func @transform_1(%arg0: i32) -> (i32, i32) {
    %c0_i32 = arith.constant 0 : i32
    %c0_i32_0 = arith.constant 0 : i32
    %c0_i32_1 = arith.constant 0 : i32
    return %c0_i32, %c0_i32_0 : i32, i32
  }
  func.func @transform_2(%arg0: i32) -> (i32, i32) {
    %c0_i32 = arith.constant 0 : i32
    %c0_i32_0 = arith.constant 0 : i32
    return %arg0, %c0_i32 : i32, i32
  }
}

</mosaic_0001>

<bundles_post_ra>
// kernel: tpu_custom_call.1
= control target key start
LH: loop header
LB: loop body
LE: loop exit
PB: predicated region body
PF: predicated region fallthrough
CT: control target
= control target key end

     0   :  { %s464_s9 = smov 0   ;;  %s506_s0 = inlined_call_operand.vmem [shape: f32[64,2,16], index: 0, kind: input, shape index: {}]   ;;  %s507_s1 = inlined_call_operand.vmem [shape: f32[16,16], index: 1, kind: input, shape index: {}]   ;;  %s508_s2 = inlined_call_operand.vmem [shape: f32[64,8], index: 2, kind: output, shape index: {}]  }
   0x1 LB: > { %s470_s10 = sadd.s32 4294967295, %s446_s9   ;;  %p425_p0 = scmp.ge.s32.totalorder %s446_s9, 1  ;;  %s446_s9 = sphi %s464_s9, %s12_s9  }
   0x2   : > { %p113_p1 = scmp.lt.s32.totalorder %s446_s9, 9 }
   0x4   : > { %p114_p2 = pnand %p425_p0, %p113_p1 }
   0x5   : > { %s426_s15 = sshll.u32 (!%p114_p2), %s470_s10, 3  ;;  %s448_s20 = smov (!%p114_p2), 120  }
   0x6   : > { %117 = sbr.rel (%p114_p2) target bundleno = 296 (0x128), region = 28  ;;  %p135_p3 = scmp.lt.s32.totalorder (!%p114_p2), %s426_s15, 63 }
   0x7   : > { %p140_p4 = scmp.lt.s32.totalorder (!%p114_p2), %s470_s10, 7 }
   0xb   : > { %v169_v0 = vld [vmem:[%s507_s1 + $0x8] sm:$0xff]  ;;  %v168_v1 = vld [vmem:[%s507_s1] sm:$0xff]  ;;  %s510_s15 = smov (!%p135_p3, %s426_s15), 63  ;;  %vm179_vm0 = vcmask 1041409   ;;  %vm182_vm1 = vcmask 1042434   ;;  %vm185_vm2 = vcmask 1043459  }
   0xc   : > { %v481_v2 = vand.u32 4294901760, %v169_v0  ;;  %v483_v3 = vand.u32 4294901760, %v168_v1  ;;  %s427_s16 = sshll.u32 %s510_s15, 1  ;;  %vm188_vm3 = vcmask 1044484   ;;  %vm191_vm4 = vcmask 1045509   ;;  %s512_s10 = smov (!%p140_p4, %s470_s10), 7 }
   0xd   : > { %s138_s19 = scalar_lea.vmem %s506_s0, %s427_s16  ;;  %vm194_vm5 = vcmask 1046534   ;;  %vm197_vm6 = vcmask 1047559   ;;  %vm199_vm7 = vcmask 130048   ;;  %s428_s21 = sshll.u32 %s512_s10, 3  ;;  %vm366_vm8 = vcmask 64512  }
   0xe   : > { %v244_v4 = vsub.f32 %v169_v0, %v481_v2  ;;  %v250_v5 = vsub.f32 %v168_v1, %v483_v3  ;;  %301 = vmatpush.msra.mxu3 %v481_v2  ;;  %217 = vmatpush.msra.mxu0 %v481_v2  ;;  %v144_v8 = vld [vmem:[%s138_s19] sm:$0x1]  ;;  %v145_v9 = vld [vmem:[%s138_s19 + $0x2] sm:$0x1]  ;;  %v146_v10 = vld [vmem:[%s138_s19 + $0x4] sm:$0x1]  ;;  %s143_s24 = scalar_lea.vmem %s508_s2, %s428_s21 }
   0xf   : > { %v147_v11 = vld [vmem:[%s138_s19 + $0x6] sm:$0x1]  ;;  %v148_v12 = vld [vmem:[%s138_s19 + $0x8] sm:$0x1]  ;;  %v149_v13 = vld [vmem:[%s138_s19 + $0xa] sm:$0x1] }
  0x10   : > { %276 = vmatpush.msra.mxu2 %v244_v4  ;;  %v245_v6 = vand.u32 4294901760, %v244_v4  ;;  %303 = vmatpush.msra.mxu3 %v483_v3  ;;  %v251_v7 = vand.u32 4294901760, %v250_v5  ;;  %v150_v15 = vld [vmem:[%s138_s19 + $0xc] sm:$0x1]  ;;  %v151_v16 = vld [vmem:[%s138_s19 + $0xe] sm:$0x1] }
  0x11   : > { %219 = vmatpush.msra.mxu0 %v483_v3  ;;  %v152_v17 = vld [vmem:[%s138_s19 + $0x1] sm:$0x1]  ;;  %v153_v18 = vld [vmem:[%s138_s19 + $0x3] sm:$0x1]  ;;  %v154_v19 = vld [vmem:[%s138_s19 + $0x5] sm:$0x1] }
  0x12   : > { %279 = vmatpush.msra.mxu2 %v250_v5  ;;  %v246_v14 = vsub.f32 %v244_v4, %v245_v6  ;;  %v155_v20 = vld [vmem:[%s138_s19 + $0x7] sm:$0x1]  ;;  %v252_v21 = vsub.f32 %v250_v5, %v251_v7  ;;  %v156_v22 = vld [vmem:[%s138_s19 + $0x9] sm:$0x1]  ;;  %v157_v23 = vld [vmem:[%s138_s19 + $0xb] sm:$0x1]  ;;  %v160_v25 = vmax.f32 %v144_v8, %v152_v17  ;;  %v161_v26 = vmax.f32 %v145_v9, %v153_v18 }
  0x13   : > { %328 = vmatpush.msrb.mxu0 %v245_v6  ;;  %v158_v24 = vld [vmem:[%s138_s19 + $0xd] sm:$0x1]  ;;  %v162_v27 = vmax.f32 %v146_v10, %v154_v19  ;;  %v163_v28 = vmax.f32 %v147_v11, %v155_v20  ;;  %v159_v29 = vld [vmem:[%s138_s19 + $0xf] sm:$0x1]  ;;  %v164_v30 = vmax.f32 %v148_v12, %v156_v22  ;;  %v165_v31 = vmax.f32 %v149_v13, %v157_v23 }
  0x14   : > { %v166_v32 = vmax.f32 %v150_v15, %v158_v24  ;;  %v247_v33 = vand.u32 4294901760, %v246_v14  ;;  %v167_v34 = vmax.f32 %v151_v16, %v159_v29  ;;  %v178_v35 = vrot.slane %v161_v26, 7 }
  0x15   : > { %332 = vmatpush.msrb.mxu0 %v251_v7  ;;  %v181_v36 = vrot.slane %v162_v27, 6  ;;  %v184_v37 = vrot.slane %v163_v28, 5  ;;  %v187_v38 = vrot.slane %v164_v30, 4  ;;  %v253_v39 = vand.u32 4294901760, %v252_v21 }
  0x16   : > { %248 = vmatpush.msra.mxu1 %v247_v33  ;;  %v180_v40 = vsel %vm179_vm0, %v178_v35, %v160_v25  ;;  %v190_v41 = vrot.slane %v165_v31, 3  ;;  %v193_v43 = vrot.slane %v166_v32, 2  ;;  %v196_v45 = vrot.slane %v167_v34, 1 }
  0x17   : > { %v183_v42 = vsel %vm182_vm1, %v181_v36, %v180_v40 }
  0x18   : > { %254 = vmatpush.msra.mxu1 %v253_v39  ;;  %v186_v44 = vsel %vm185_vm2, %v184_v37, %v183_v42 }
  0x19   : > { %v189_v46 = vsel %vm188_vm3, %v187_v38, %v186_v44 }
  0x1a   : > { %353 = vmatpush.msrb.mxu1 %v481_v2  ;;  %v192_v47 = vsel %vm191_vm4, %v190_v41, %v189_v46 }
  0x1b   : > { %v195_v48 = vsel %vm194_vm5, %v193_v43, %v192_v47 }
  0x1c   : > { %355 = vmatpush.msrb.mxu1 %v483_v3  ;;  %v198_v49 = vsel %vm197_vm6, %v196_v45, %v195_v48 }
  0x1d   : > { %v200_v50 = vsel %vm199_vm7, %v198_v49, 0 }
  0x1e   : > { %v220_v51 = vand.u32 4294901760, %v200_v50 }
  0x20   : > { %v221_v52 = vsub.f32 %v200_v50, %v220_v51  ;;  %256 = vmatmul.f32.vlgmr.msra.gmra.mxu1 %v220_v51 }
  0x22   : > { %282 = vmatmul.f32.vlgmr.msra.gmra.mxu2 %v221_v52  ;;  %v222_v53 = vand.u32 4294901760, %v221_v52 }
  0x24   : > { %307 = vmatmul.f32.vlgmr.msra.gmra.mxu3 %v222_v53  ;;  %v223_v54 = vsub.f32 %v221_v52, %v222_v53 }
  0x26   : > { %v224_v55 = vand.u32 4294901760, %v223_v54 }
  0x28   : > { %225 = vmatmul.f32.vlgmr.msra.gmra.mxu0 %v224_v55  ;;  %357 = vmatmul.f32.vlgmr.msrb.gmra.mxu1 %v220_v51 }
  0x30   : > { %334 = vmatmul.f32.vlgmr.msrb.gmra.mxu0 %v220_v51 }
  0x9d   : > { %v257_v56 = vpop.f32.mrf.mxu1 }
  0xa5   : > { %v226_v57 = vpop.f32.mrf.mxu0  ;;  %v283_v58 = vpop.f32.mrf.mxu2 }
  0xa6   : > { %v258_v59 = vadd.f32 %v257_v56, %v226_v57  ;;  %v358_v0 = vpop.f32.mrf.mxu1 }
  0xa7   : > { %v308_v61 = vpop.f32.mrf.mxu3 }
  0xa8   : > { %v284_v60 = vadd.f32 %v283_v58, %v258_v59 }
  0xaa   : > { %v309_v62 = vadd.f32 %v308_v61, %v284_v60 }
  0xad   : > { %v335_v63 = vpop.f32.mrf.mxu0 }
  0xae   : > { %v336_v1 = vadd.f32 %v335_v63, %v309_v62 }
  0xb0   : > { %v359_v2 = vadd.f32 %v358_v0, %v336_v1 }
  0xb2   : > { %362 = vrot.lane.b32.xlu0 %v359_v2, %s448_s20 }
 0x124   : > { %v363_v3 = vpop.permute.xlu0 %362 }
 0x125   : > { %v365_v4 = vmax.f32 %v359_v2, %v363_v3 }
 0x127   : > { %367 = vst.msk [vmem:[%s143_s24] sm:$0xff] %vm366_vm8, %v365_v4 }
 0x128 PF: > { %s12_s9 = sadd.s32 1, %s446_s9  }
 0x129   : > { %p9_p5 = scmp.ge.s32.totalorder %s12_s9, 10  }
 0x12b   :  { %11 = sbr.rel (!%p9_p5) target bundleno = 1 (0x1), region = 58 }

</bundles_post_ra>
